<compile_context>
chip_gen: v6e
topology: v6e:2x2x1
jax: 0.10.0
libtpu: 0.0.40
codegen_flags: <defaults>
</compile_context>

<pallas_src>
import math

import jax
import jax.numpy as jnp
from jax.experimental import pallas as pl
from jax.experimental.pallas import tpu as pltpu  # noqa: F401  (TPU backend)

EPS = 1e-5
LANE = 128
BF16_SUBLANE = 16  # bf16 sublane packing: row offsets must be multiples of 16


def _round_up(n, m):
    return ((n + m - 1) // m) * m


def _pad_axis(a, axis, size):
    pad = size - a.shape[axis]
    if pad == 0:
        return a
    widths = [(0, 0)] * a.ndim
    widths[axis] = (0, pad)
    return jnp.pad(a, widths)


# ----------------------------------------------------------------------------
# Kernel
# ----------------------------------------------------------------------------
def _mlp_bn_kernel(x_ref, w_ref, vec_ref, o_ref):
    B, D = x_ref.shape          # D = padded input dim (multiple of 16)
    W = w_ref.shape[1]          # shared padded feature width (multiple of 128)
    inv_b = jnp.float32(1.0 / B)

    # Packed vector params (f32): rows = [g1, be1, g2, be2, b3, pad, pad, pad].
    g1, be1 = vec_ref[0:1, :], vec_ref[1:2, :]
    g2, be2 = vec_ref[2:3, :], vec_ref[3:4, :]
    b3 = vec_ref[4:5, :]

    def bn_relu(h, g, be):
        # Training-mode BN: batch mean + biased batch variance, computed as
        # f32 sublane reductions (XLU) -- keeps the MXU chain to the 3 real
        # layer matmuls.  Padded columns have gamma=beta=0 and stay exactly 0.
        mu = jnp.sum(h, axis=0, keepdims=True) * inv_b
        c = h - mu
        var = jnp.sum(c * c, axis=0, keepdims=True) * inv_b
        return jnp.maximum(c * jax.lax.rsqrt(var + EPS) * g + be, 0.0)

    # Weight slab rows: [0:D] = w1, [D:D+W] = w2, [D+W:D+2W] = w3.
    # fc1 (+bn1+relu).  b1 dropped: cancels exactly under training-mode BN.
    h1 = jnp.dot(x_ref[...].astype(jnp.bfloat16), w_ref[0:D, :],
                 preferred_element_type=jnp.float32)
    h1 = bn_relu(h1, g1, be1)

    # fc2 (+bn2+relu).  b2 dropped for the same reason.
    h2 = jnp.dot(h1.astype(jnp.bfloat16), w_ref[D:D + W, :],
                 preferred_element_type=jnp.float32)
    h2 = bn_relu(h2, g2, be2)

    # fc3 -- lane-dense padded output (padded columns are exactly zero).
    out = jnp.dot(h2.astype(jnp.bfloat16), w_ref[D + W:D + 2 * W, :],
                  preferred_element_type=jnp.float32) + b3
    o_ref[...] = out.astype(o_ref.dtype)


# ----------------------------------------------------------------------------
# Wrapper
# ----------------------------------------------------------------------------
def torch_net_forward(x, kp, trim_output=False):
    """x: [B, input_dim] float32. kp: packed params from pack_params().

    Returns [B, width] padded output by default (padded cols are exactly 0);
    pass trim_output=True for the module-exact [B, output_dim] shape.
    """
    B = x.shape[0]
    in_p = kp["in_dim_padded"]
    if x.shape[1] != in_p:
        x = _pad_axis(x, 1, in_p)  # compile-time no-op when already aligned
    W = kp["w"].shape[1]

    args = (x, kp["w"], kp["vec"])
    full = lambda a: pl.BlockSpec(a.shape, lambda: (0,) * a.ndim)

    out = pl.pallas_call(
        _mlp_bn_kernel,
        out_shape=jax.ShapeDtypeStruct((B, W), jnp.float32),
        grid=(),
        in_specs=[full(a) for a in args],
        out_specs=pl.BlockSpec((B, W), lambda: (0, 0)),
    )(*args)
    if trim_output:
        return out[:, :kp["out_dim"]]
    return out


# ----------------------------------------------------------------------------
# Parameters
# ----------------------------------------------------------------------------
def init_params(key, input_dim, hidden1=128, hidden2=64, output_dim=10):
    """Raw f32 params matching nn.Linear / nn.BatchNorm1d shapes.

    Linear weights are stored pre-transposed as [in, out]; biases / BN params
    as 1-D [F] vectors (like PyTorch).
    """
    ks = jax.random.split(key, 6)

    def linear(kw, kb, fan_in, fan_out):
        bound = 1.0 / math.sqrt(fan_in)
        w = jax.random.uniform(kw, (fan_in, fan_out), jnp.float32, -bound, bound)
        b = jax.random.uniform(kb, (fan_out,), jnp.float32, -bound, bound)
        return w, b

    w1, b1 = linear(ks[0], ks[1], input_dim, hidden1)
    w2, b2 = linear(ks[2], ks[3], hidden1, hidden2)
    w3, b3 = linear(ks[4], ks[5], hidden2, output_dim)

    return {
        "w1": w1, "b1": b1,
        "g1": jnp.ones((hidden1,), jnp.float32),
        "be1": jnp.zeros((hidden1,), jnp.float32),
        "w2": w2, "b2": b2,
        "g2": jnp.ones((hidden2,), jnp.float32),
        "be2": jnp.zeros((hidden2,), jnp.float32),
        "w3": w3, "b3": b3,
    }


def pack_params(p):
    """Pack for the kernel:
      * one bf16 weight slab [in_p + 2*width, width], zero-padded so padded
        columns stay exactly zero through BN/ReLU/fc3,
      * one f32 [8, width] vector slab = [g1, be1, g2, be2, b3, 0, 0, 0].
    b1/b2 are intentionally NOT packed (they cancel under training-mode BN).
    """
    input_dim, hidden1 = p["w1"].shape
    hidden2 = p["w2"].shape[1]
    output_dim = p["w3"].shape[1]

    in_p = _round_up(input_dim, BF16_SUBLANE)
    width = max(_round_up(hidden1, LANE),
                _round_up(hidden2, LANE),
                _round_up(output_dim, LANE))

    w1 = _pad_axis(_pad_axis(p["w1"], 0, in_p), 1, width)
    w2 = _pad_axis(_pad_axis(p["w2"], 0, width), 1, width)
    w3 = _pad_axis(_pad_axis(p["w3"], 0, width), 1, width)
    w = jnp.concatenate([w1, w2, w3], axis=0).astype(jnp.bfloat16)

    def row(v):
        return _pad_axis(v[None, :].astype(jnp.float32), 1, width)

    vec = jnp.concatenate(
        [row(p["g1"]), row(p["be1"]),
         row(p["g2"]), row(p["be2"]),
         row(p["b3"]),
         jnp.zeros((3, width), jnp.float32)],
        axis=0)  # [8, width]

    return {"w": w, "vec": vec,
            "in_dim_padded": in_p, "out_dim": output_dim}


# ----------------------------------------------------------------------------
# Pure-JAX references
# ----------------------------------------------------------------------------
def _reference(x, p, matmul_dtype=jnp.float32):
    """Mirrors the PyTorch forward (training-mode BN, biases included).
    `matmul_dtype=bfloat16` reproduces the kernel's MXU input precision."""
    def dot(a, b):
        return jnp.dot(a.astype(matmul_dtype), b.astype(matmul_dtype),
                       preferred_element_type=jnp.float32)

    def bn(h, g, be):
        mu = jnp.mean(h, axis=0, keepdims=True)
        var = jnp.mean((h - mu) ** 2, axis=0, keepdims=True)  # biased
        return (h - mu) * jax.lax.rsqrt(var + EPS) * g + be

    h = jnp.maximum(bn(dot(x, p["w1"]) + p["b1"], p["g1"], p["be1"]), 0.0)
    h = jnp.maximum(bn(dot(h, p["w2"]) + p["b2"], p["g2"], p["be2"]), 0.0)
    return dot(h, p["w3"]) + p["b3"]


if __name__ == "__main__":
    key = jax.random.PRNGKey(0)
    k_x, k_p = jax.random.split(key)

    B, input_dim = 8, 32
    x = jax.random.normal(k_x, (B, input_dim), jnp.float32)

    raw = init_params(k_p, input_dim, hidden1=128, hidden2=64, output_dim=10)
    packed = pack_params(raw)

    out_padded = torch_net_forward(x, packed)       # lane-dense [B, 128]
    out_padded = jax.block_until_ready(out_padded)
    assert out_padded.shape == (B, 128)
    # Padded columns are exactly zero end-to-end.
    assert bool(jnp.all(out_padded[:, 10:] == 0.0)), "padded cols not zero"

    out = out_padded[:, :10]  # test-harness view; module-exact shape

    # Tight check vs. a reference with matching bf16-matmul precision
    # (also validates that dropping b1/b2 under training-mode BN is exact).
    ref_bf16 = _reference(x, raw, matmul_dtype=jnp.bfloat16)
    assert jnp.allclose(out, ref_bf16, atol=2e-3, rtol=2e-3), \
        "mismatch vs bf16-matched reference"

    # Loose sanity check vs. the full-f32 PyTorch-style reference
    # (difference is only bf16 quantization of the MXU inputs).
    ref_f32 = _reference(x, raw, matmul_dtype=jnp.float32)
    assert jnp.allclose(out, ref_f32, atol=2e-1, rtol=2e-1), \
        "mismatch vs f32 reference"

    print("KERNEL_OK")
</pallas_src>

<mosaic_0001>
module attributes {stable_mosaic.version = 11 : i64} {
  func.func @_mlp_bn_kernel(%arg0: memref<8x32xf32, #tpu.memory_space<vmem>>, %arg1: memref<288x128xbf16, #tpu.memory_space<vmem>>, %arg2: memref<8x128xf32, #tpu.memory_space<vmem>>, %arg3: memref<8x128xf32, #tpu.memory_space<vmem>>) attributes {dimension_semantics = [], scalar_prefetch = 0 : i64, scratch_operands = 0 : i64, tpu.core_type = #tpu.core_type<tc>} {
    %c0 = arith.constant 0 : index
    %c0_0 = arith.constant 0 : index
    %0 = vector.load %arg2[%c0, %c0_0] : memref<8x128xf32, #tpu.memory_space<vmem>>, vector<1x128xf32>
    %c1 = arith.constant 1 : index
    %c0_1 = arith.constant 0 : index
    %1 = vector.load %arg2[%c1, %c0_1] : memref<8x128xf32, #tpu.memory_space<vmem>>, vector<1x128xf32>
    %c2 = arith.constant 2 : index
    %c0_2 = arith.constant 0 : index
    %2 = vector.load %arg2[%c2, %c0_2] : memref<8x128xf32, #tpu.memory_space<vmem>>, vector<1x128xf32>
    %c3 = arith.constant 3 : index
    %c0_3 = arith.constant 0 : index
    %3 = vector.load %arg2[%c3, %c0_3] : memref<8x128xf32, #tpu.memory_space<vmem>>, vector<1x128xf32>
    %c4 = arith.constant 4 : index
    %c0_4 = arith.constant 0 : index
    %4 = vector.load %arg2[%c4, %c0_4] : memref<8x128xf32, #tpu.memory_space<vmem>>, vector<1x128xf32>
    %c0_5 = arith.constant 0 : index
    %c0_6 = arith.constant 0 : index
    %5 = vector.load %arg0[%c0_5, %c0_6] : memref<8x32xf32, #tpu.memory_space<vmem>>, vector<8x32xf32>
    %6 = arith.truncf %5 : vector<8x32xf32> to vector<8x32xbf16>
    %c0_7 = arith.constant 0 : index
    %c0_8 = arith.constant 0 : index
    %7 = vector.load %arg1[%c0_7, %c0_8] : memref<288x128xbf16, #tpu.memory_space<vmem>>, vector<32x128xbf16>
    %cst = arith.constant dense<0.000000e+00> : vector<8x128xf32>
    %8 = tpu.matmul %6, %7, %cst {dimension_numbers = #tpu.dot_dimension_numbers<[1], [0], [0], [1], [0, 0, 1, 1], [], []>} : vector<8x32xbf16>, vector<32x128xbf16>, vector<8x128xf32> -> vector<8x128xf32>
    %cst_9 = arith.constant dense<0.000000e+00> : vector<128xf32>
    %9 = vector.multi_reduction <add>, %8, %cst_9 [0] : vector<8x128xf32> to vector<128xf32>
    %10 = vector.shape_cast %9 : vector<128xf32> to vector<1x128xf32>
    %cst_10 = arith.constant 1.250000e-01 : f32
    %11 = vector.broadcast %cst_10 : f32 to vector<1x128xf32>
    %12 = arith.mulf %10, %11 : vector<1x128xf32>
    %13 = vector.broadcast %12 : vector<1x128xf32> to vector<8x128xf32>
    %14 = arith.subf %8, %13 : vector<8x128xf32>
    %15 = arith.mulf %14, %14 : vector<8x128xf32>
    %cst_11 = arith.constant dense<0.000000e+00> : vector<128xf32>
    %16 = vector.multi_reduction <add>, %15, %cst_11 [0] : vector<8x128xf32> to vector<128xf32>
    %17 = vector.shape_cast %16 : vector<128xf32> to vector<1x128xf32>
    %cst_12 = arith.constant 1.250000e-01 : f32
    %18 = vector.broadcast %cst_12 : f32 to vector<1x128xf32>
    %19 = arith.mulf %17, %18 : vector<1x128xf32>
    %cst_13 = arith.constant 9.99999974E-6 : f32
    %20 = vector.broadcast %cst_13 : f32 to vector<1x128xf32>
    %21 = arith.addf %19, %20 : vector<1x128xf32>
    %22 = math.rsqrt %21 : vector<1x128xf32>
    %23 = vector.broadcast %22 : vector<1x128xf32> to vector<8x128xf32>
    %24 = arith.mulf %14, %23 : vector<8x128xf32>
    %25 = vector.broadcast %0 : vector<1x128xf32> to vector<8x128xf32>
    %26 = arith.mulf %24, %25 : vector<8x128xf32>
    %27 = vector.broadcast %1 : vector<1x128xf32> to vector<8x128xf32>
    %28 = arith.addf %26, %27 : vector<8x128xf32>
    %cst_14 = arith.constant 0.000000e+00 : f32
    %29 = vector.broadcast %cst_14 : f32 to vector<8x128xf32>
    %30 = arith.maximumf %28, %29 : vector<8x128xf32>
    %31 = arith.truncf %30 : vector<8x128xf32> to vector<8x128xbf16>
    %c32 = arith.constant 32 : index
    %c0_15 = arith.constant 0 : index
    %32 = vector.load %arg1[%c32, %c0_15] : memref<288x128xbf16, #tpu.memory_space<vmem>>, vector<128x128xbf16>
    %cst_16 = arith.constant dense<0.000000e+00> : vector<8x128xf32>
    %33 = tpu.matmul %31, %32, %cst_16 {dimension_numbers = #tpu.dot_dimension_numbers<[1], [0], [0], [1], [0, 0, 1, 1], [], []>} : vector<8x128xbf16>, vector<128x128xbf16>, vector<8x128xf32> -> vector<8x128xf32>
    %cst_17 = arith.constant dense<0.000000e+00> : vector<128xf32>
    %34 = vector.multi_reduction <add>, %33, %cst_17 [0] : vector<8x128xf32> to vector<128xf32>
    %35 = vector.shape_cast %34 : vector<128xf32> to vector<1x128xf32>
    %cst_18 = arith.constant 1.250000e-01 : f32
    %36 = vector.broadcast %cst_18 : f32 to vector<1x128xf32>
    %37 = arith.mulf %35, %36 : vector<1x128xf32>
    %38 = vector.broadcast %37 : vector<1x128xf32> to vector<8x128xf32>
    %39 = arith.subf %33, %38 : vector<8x128xf32>
    %40 = arith.mulf %39, %39 : vector<8x128xf32>
    %cst_19 = arith.constant dense<0.000000e+00> : vector<128xf32>
    %41 = vector.multi_reduction <add>, %40, %cst_19 [0] : vector<8x128xf32> to vector<128xf32>
    %42 = vector.shape_cast %41 : vector<128xf32> to vector<1x128xf32>
    %cst_20 = arith.constant 1.250000e-01 : f32
    %43 = vector.broadcast %cst_20 : f32 to vector<1x128xf32>
    %44 = arith.mulf %42, %43 : vector<1x128xf32>
    %cst_21 = arith.constant 9.99999974E-6 : f32
    %45 = vector.broadcast %cst_21 : f32 to vector<1x128xf32>
    %46 = arith.addf %44, %45 : vector<1x128xf32>
    %47 = math.rsqrt %46 : vector<1x128xf32>
    %48 = vector.broadcast %47 : vector<1x128xf32> to vector<8x128xf32>
    %49 = arith.mulf %39, %48 : vector<8x128xf32>
    %50 = vector.broadcast %2 : vector<1x128xf32> to vector<8x128xf32>
    %51 = arith.mulf %49, %50 : vector<8x128xf32>
    %52 = vector.broadcast %3 : vector<1x128xf32> to vector<8x128xf32>
    %53 = arith.addf %51, %52 : vector<8x128xf32>
    %cst_22 = arith.constant 0.000000e+00 : f32
    %54 = vector.broadcast %cst_22 : f32 to vector<8x128xf32>
    %55 = arith.maximumf %53, %54 : vector<8x128xf32>
    %56 = arith.truncf %55 : vector<8x128xf32> to vector<8x128xbf16>
    %c160 = arith.constant 160 : index
    %c0_23 = arith.constant 0 : index
    %57 = vector.load %arg1[%c160, %c0_23] : memref<288x128xbf16, #tpu.memory_space<vmem>>, vector<128x128xbf16>
    %cst_24 = arith.constant dense<0.000000e+00> : vector<8x128xf32>
    %58 = tpu.matmul %56, %57, %cst_24 {dimension_numbers = #tpu.dot_dimension_numbers<[1], [0], [0], [1], [0, 0, 1, 1], [], []>} : vector<8x128xbf16>, vector<128x128xbf16>, vector<8x128xf32> -> vector<8x128xf32>
    %59 = vector.broadcast %4 : vector<1x128xf32> to vector<8x128xf32>
    %60 = arith.addf %58, %59 : vector<8x128xf32>
    %c0_25 = arith.constant 0 : index
    %c0_26 = arith.constant 0 : index
    %61 = vector.load %arg3[%c0_25, %c0_26] : memref<8x128xf32, #tpu.memory_space<vmem>>, vector<8x128xf32>
    tpu.vector_store %arg3[%c0_25, %c0_26], %60 {strides = array<i32>} : memref<8x128xf32, #tpu.memory_space<vmem>>, vector<8x128xf32>,
    return
  }
}

</mosaic_0001>

<bundles_post_ra>
// kernel: tpu_custom_call.1
= control target key start
LH: loop header
LB: loop body
LE: loop exit
PB: predicated region body
PF: predicated region fallthrough
CT: control target
= control target key end

     0   :  { %8 = vsyncpa [#allocation3], 0  ;;  %s681_s0 = inlined_call_operand.hbm [shape: f32[8,32], index: 0, kind: input, shape index: {}]   ;;  %s682_s1 = inlined_call_operand.hbm [shape: bf16[288,128], index: 1, kind: input, shape index: {}]   ;;  %s683_s2 = inlined_call_operand.hbm [shape: f32[8,128], index: 2, kind: input, shape index: {}]   ;;  %s684_s3 = inlined_call_operand.hbm [shape: f32[8,128], index: 3, kind: output, shape index: {}]  }
   0x1   :  { %9 = vsyncpa [#allocation6], 0 }
   0x2   :  { %10 = vsyncpa [#allocation4], 0  ;;  %s620_s12 = smov [#allocation5]  }
   0x3   :  { %s26_s13 = sshll.u32 %s620_s12, 4  ;;  %s27_s13 = int_to_ptr.vmem [resolvable:$true] %s26_s13 }
   0x4   :  { %s542_s14 = scalar_lea.vmem %s27_s13, 2304  ;;  %p547_p1 = scmp.lt.s32.totalorder %s27_s13, %s27_s13 }
   0x5   :  { %p543_p0 = scmp.ne.s32.totalorder %s27_s13, %s542_s14  ;;  %p548_p2 = scmp.lt.s32.totalorder %s542_s14, %s542_s14 }
   0x7   :  { %p549_p3 = por %p548_p2, %p547_p1 }
   0x9   :  { %p550_p4 = pnand %p549_p3, %p543_p0 }
   0xb   :  { %553 = shalt.err (!%p550_p4)
}
   0xc   :  { %s621_s15 = smov 64   ;;  %s622_s16 = smov 4  }
   0xd   :  { %32 = dma.hbm_to_vmem [thread:$0]  %s682_s1, 2304, %s27_s13, [#allocation6], %s621_s15, %s621_s15, %s622_s16  }
   0xe   :  { %s623_s19 = smov [#allocation2]   ;;  %s624_s21 = smov [#allocation7]  }
   0xf   :  { %s17_s20 = sshll.u32 %s623_s19, 4  ;;  %s39_s22 = sshll.u32 %s624_s21, 4  ;;  %s18_s20 = int_to_ptr.vmem [resolvable:$true] %s17_s20  ;;  %s40_s22 = int_to_ptr.vmem [resolvable:$true] %s39_s22 }
  0x10   :  { %s562_s23 = scalar_lea.vmem %s18_s20, 128  ;;  %p567_p6 = scmp.lt.s32.totalorder %s18_s20, %s18_s20 }
  0x11   :  { %p563_p5 = scmp.ne.s32.totalorder %s18_s20, %s562_s23  ;;  %p568_p7 = scmp.lt.s32.totalorder %s562_s23, %s562_s23 }
  0x13   :  { %p569_p8 = por %p568_p7, %p567_p6 }
  0x15   :  { %p570_p9 = pnand %p569_p8, %p563_p5 }
  0x17   :  { %573 = shalt.err (!%p570_p9)
}
  0x18   :  { %20 = dma.hbm_to_vmem [thread:$0]  %s681_s0, 128, %s18_s20, [#allocation3]  }
  0x19   :  { %s582_s26 = scalar_lea.vmem %s40_s22, 128  ;;  %p587_p11 = scmp.lt.s32.totalorder %s40_s22, %s40_s22 }
  0x1a   :  { %p583_p10 = scmp.ne.s32.totalorder %s40_s22, %s582_s26  ;;  %p588_p12 = scmp.lt.s32.totalorder %s582_s26, %s582_s26 }
  0x1c   :  { %p589_p13 = por %p588_p12, %p587_p11 }
  0x1e   :  { %p590_p0 = pnand %p589_p13, %p583_p10 }
  0x20   :  { %593 = shalt.err (!%p590_p0)
}
  0x21   :  { %42 = dma.hbm_to_vmem [thread:$0]  %s683_s2, 128, %s40_s22, [#allocation6]  }
  0x22   :  { %614 = dma.done.wait [#allocation3], 128  }
  0x23   :  { %615 = vsyncadd [#allocation3], 4294967168 }
  0x24   :  { %616 = dma.done.wait [#allocation6], 2432  }
  0x25   :  { %617 = vsyncadd [#allocation6], 4294964864  ;;  %v625_v0 = vmov 0.0   ;;  %vm626_vm0 = vmmov 0   ;;  %v512_v1 = vld [vmem:[#allocation5 + $0x8] sm:$0xff]   ;;  %v513_v2 = vld [vmem:[#allocation5] sm:$0xff]  }
  0x26   :  { %456 = vmatprep.subr.bf16.mxu0 %v625_v0  ;;  %460 = vmatprep.mubr.msk.bf16.mxu0 %vm626_vm0, %v625_v0  ;;  %v58_v3 = vld [vmem:[#allocation2] sm:$0xff]  ;;  %vm76_vm1 = vcmask 261120   ;;  %v514_v5 = vld [vmem:[#allocation5 + $0x48] sm:$0xff]   ;;  %v515_v6 = vld [vmem:[#allocation5 + $0x40] sm:$0xff]   ;;  %s627_s0 = smov [#allocation8]  }
  0x27   :  { %464 = vmatprep.subr.bf16.mxu1 %v625_v0  ;;  %480 = vmatprep.mubr.msk.bf16.mxu1 %vm626_vm0, %v625_v0  ;;  %v59_v4 = vpack.c.bf16 %v58_v3, %v58_v3  ;;  %v516_v7 = vld [vmem:[#allocation5 + $0x38] sm:$0xff]   ;;  %v517_v8 = vld [vmem:[#allocation5 + $0x30] sm:$0xff]   ;;  %v518_v9 = vld [vmem:[#allocation5 + $0x28] sm:$0xff]   ;;  %s401_s2 = sshll.u32 %s627_s0, 4  ;;  %s402_s2 = int_to_ptr.vmem [resolvable:$true] %s401_s2 }
  0x28   :  { %457 = vmatpush3.bf16.msra.mxu0 %v512_v1  ;;  %465 = vmatpush3.bf16.msra.mxu1 %v514_v5  ;;  %v519_v10 = vld [vmem:[#allocation5 + $0x20] sm:$0xff]   ;;  %v520_v11 = vld [vmem:[#allocation5 + $0x18] sm:$0xff]   ;;  %v521_v12 = vld [vmem:[#allocation5 + $0x10] sm:$0xff]   ;;  %s594_s28 = scalar_lea.vmem %s402_s2, 128  ;;  %p599_p2 = scmp.lt.s32.totalorder %s402_s2, %s402_s2 }
  0x29   :  { %458 = vmatprep.subr.bf16.mxu0 %v625_v0  ;;  %466 = vmatprep.subr.bf16.mxu1 %v625_v0  ;;  %v414_v35 = vld [vmem:[#allocation7] ss:$0 sm:$0xff]  ;;  %v415_v37 = vld [vmem:[#allocation7 + $0x1] ss:$0 sm:$0xff]  ;;  %v522_v42 = vld [vmem:[#allocation5 + $0x88] sm:$0xff]   ;;  %p595_p1 = scmp.ne.s32.totalorder %s402_s2, %s594_s28  ;;  %p600_p3 = scmp.lt.s32.totalorder %s594_s28, %s594_s28 }
  0x2a   :  { %v523_v43 = vld [vmem:[#allocation5 + $0x80] sm:$0xff]   ;;  %v524_v44 = vld [vmem:[#allocation5 + $0x78] sm:$0xff]   ;;  %v525_v45 = vld [vmem:[#allocation5 + $0x70] sm:$0xff]  }
  0x2b   :  { %v526_v46 = vld [vmem:[#allocation5 + $0x68] sm:$0xff]   ;;  %v527_v47 = vld [vmem:[#allocation5 + $0x60] sm:$0xff]   ;;  %v528_v48 = vld [vmem:[#allocation5 + $0x58] sm:$0xff]   ;;  %p601_p4 = por %p600_p3, %p599_p2 }
  0x2c   :  { %459 = vmatpush3.bf16.msra.mxu0 %v513_v2  ;;  %467 = vmatpush3.bf16.msra.mxu1 %v515_v6  ;;  %v529_v49 = vld [vmem:[#allocation5 + $0x50] sm:$0xff]  }
  0x2d   :  { %484 = vmatprep.subr.bf16.mxu0 %v625_v0  ;;  %468 = vmatprep.subr.bf16.mxu1 %v625_v0  ;;  %p602_p5 = pnand %p601_p4, %p595_p1 }
  0x2f   :  { %461 = vmatmul.mubr.msk.bf16.vlgmr.msra.gmra.mxu0 %vm76_vm1, %v59_v4 }
  0x30   :  { %500 = vmatprep.mubr.msk.bf16.mxu0 %vm626_vm0, %v625_v0  ;;  %469 = vmatpush3.bf16.msra.mxu1 %v516_v7 }
  0x31   :  { %470 = vmatprep.subr.bf16.mxu1 %v625_v0  ;;  %485 = vmatpush3.bf16.msra.mxu0 %v522_v42 }
  0x32   :  { %486 = vmatprep.subr.bf16.mxu0 %v625_v0 }
  0x34   :  { %471 = vmatpush3.bf16.msra.mxu1 %v517_v8  ;;  %v424_v8 = vld [vmem:[#allocation7 + $0x2] ss:$0 sm:$0xff] }
  0x35   :  { %472 = vmatprep.subr.bf16.mxu1 %v625_v0  ;;  %487 = vmatpush3.bf16.msra.mxu0 %v523_v43 }
  0x36   :  { %488 = vmatprep.subr.bf16.mxu0 %v625_v0 }
  0x38   :  { %473 = vmatpush3.bf16.msra.mxu1 %v518_v9 }
  0x39   :  { %474 = vmatprep.subr.bf16.mxu1 %v625_v0  ;;  %489 = vmatpush3.bf16.msra.mxu0 %v524_v44 }
  0x3a   :  { %490 = vmatprep.subr.bf16.mxu0 %v625_v0 }
  0x3c   :  { %475 = vmatpush3.bf16.msra.mxu1 %v519_v10  ;;  %v425_v10 = vld [vmem:[#allocation7 + $0x3] ss:$0 sm:$0xff] }
  0x3d   :  { %476 = vmatprep.subr.bf16.mxu1 %v625_v0  ;;  %491 = vmatpush3.bf16.msra.mxu0 %v525_v45 }
  0x3e   :  { %492 = vmatprep.subr.bf16.mxu0 %v625_v0 }
  0x40   :  { %477 = vmatpush3.bf16.msra.mxu1 %v520_v11 }
  0x41   :  { %478 = vmatprep.subr.bf16.mxu1 %v625_v0  ;;  %493 = vmatpush3.bf16.msra.mxu0 %v526_v46 }
  0x42   :  { %494 = vmatprep.subr.bf16.mxu0 %v625_v0 }
  0x44   :  { %479 = vmatpush3.bf16.msra.mxu1 %v521_v12 }
  0x45   :  { %495 = vmatpush3.bf16.msra.mxu0 %v527_v47 }
  0x46   :  { %496 = vmatprep.subr.bf16.mxu0 %v625_v0 }
  0x49   :  { %497 = vmatpush3.bf16.msra.mxu0 %v528_v48 }
  0x4a   :  { %498 = vmatprep.subr.bf16.mxu0 %v625_v0 }
  0x4d   :  { %499 = vmatpush3.bf16.msra.mxu0 %v529_v49 }
  0xef   :  { %v114_v13 = vpop.f32.mrf.mxu0 }
  0xf0   :  { %v120_v14 = vrot.slane %v114_v13, 4 }
  0xf1   :  { %v462_v15 = vpop.f32.mrf.mxu0 }
  0xf2   :  { %v121_v16 = vadd.f32 %v120_v14, %v114_v13  ;;  %v426_v15 = vld [vmem:[#allocation7 + $0x4] ss:$0 sm:$0xff] }
  0xf3   :  { %v117_v17 = vpop.f32.mrf.mxu0 }
  0xf4   :  { %v122_v18 = vrot.slane %v121_v16, 2 }
  0xf5   :  { %v463_v19 = vpop.f32.mrf.mxu0 }
  0xf6   :  { %v123_v20 = vadd.f32 %v122_v18, %v121_v16 }
  0xf8   :  { %v124_v21 = vrot.slane %v123_v20, 1 }
  0xfa   :  { %v125_v22 = vadd.f32 %v124_v21, %v123_v20 }
  0xfc   :  { %v126_v23 = vmul.f32 0.125, %v125_v22 }
  0xfe   :  { %v127_v24 = vsub.f32 %v114_v13, %v126_v23 }
 0x100   :  { %v128_v25 = vmul.f32 %v127_v24, %v127_v24 }
 0x102   :  { %v129_v26 = vrot.slane %v128_v25, 4 }
 0x104   :  { %v130_v27 = vadd.f32 %v129_v26, %v128_v25 }
 0x106   :  { %v131_v28 = vrot.slane %v130_v27, 2 }
 0x108   :  { %v132_v29 = vadd.f32 %v131_v28, %v130_v27 }
 0x10a   :  { %v133_v30 = vrot.slane %v132_v29, 1 }
 0x10c   :  { %v134_v31 = vadd.f32 %v133_v30, %v132_v29 }
 0x10e   :  { %v135_v32 = vmul.f32 0.125, %v134_v31 }
 0x110   :  { %v136_v33 = vadd.f32 1e-05, %v135_v32 }
 0x112   :  { %530 = vrsqrt.f32 %v136_v33 }
 0x11f   :  { %v531_v34 = vpop.eup %530 }
 0x120   :  { %v138_v36 = vmul.f32 %v531_v34, %v127_v24 }
 0x122   :  { %v143_v38 = vmul.f32 %v414_v35, %v138_v36 }
 0x124   :  { %v148_v39 = vadd.f32 %v415_v37, %v143_v38 }
 0x126   :  { %v149_v40 = vmax.f32 %v148_v39, 0.0 }
 0x128   :  { %v150_v41 = vpack.c.bf16 %v149_v40, %v149_v40 }
 0x12a   :  { %481 = vmatmul.mubr.bf16.vlgmr.msra.gmra.mxu1 %v150_v41 }
 0x1ea   :  { %v249_v50 = vpop.f32.mrf.mxu1 }
 0x1eb   :  { %v255_v51 = vrot.slane %v249_v50, 4 }
 0x1ec   :  { %v482_v52 = vpop.f32.mrf.mxu1 }
 0x1ed   :  { %v256_v53 = vadd.f32 %v255_v51, %v249_v50 }
 0x1ee   :  { %v252_v54 = vpop.f32.mrf.mxu1 }
 0x1ef   :  { %v257_v55 = vrot.slane %v256_v53, 2 }
 0x1f0   :  { %v483_v56 = vpop.f32.mrf.mxu1 }
 0x1f1   :  { %v258_v57 = vadd.f32 %v257_v55, %v256_v53 }
 0x1f3   :  { %v259_v58 = vrot.slane %v258_v57, 1 }
 0x1f5   :  { %v260_v59 = vadd.f32 %v259_v58, %v258_v57 }
 0x1f7   :  { %v261_v60 = vmul.f32 0.125, %v260_v59 }
 0x1f9   :  { %v262_v61 = vsub.f32 %v249_v50, %v261_v60 }
 0x1fb   :  { %v263_v62 = vmul.f32 %v262_v61, %v262_v61 }
 0x1fd   :  { %v264_v63 = vrot.slane %v263_v62, 4 }
 0x1ff   :  { %v265_v1 = vadd.f32 %v264_v63, %v263_v62 }
 0x201   :  { %v266_v2 = vrot.slane %v265_v1, 2 }
 0x203   :  { %v267_v3 = vadd.f32 %v266_v2, %v265_v1 }
 0x205   :  { %v268_v4 = vrot.slane %v267_v3, 1 }
 0x207   :  { %v269_v0 = vadd.f32 %v268_v4, %v267_v3 }
 0x209   :  { %v270_v5 = vmul.f32 0.125, %v269_v0 }
 0x20b   :  { %v271_v6 = vadd.f32 1e-05, %v270_v5 }
 0x20d   :  { %532 = vrsqrt.f32 %v271_v6 }
 0x21a   :  { %v533_v7 = vpop.eup %532 }
 0x21b   :  { %v273_v9 = vmul.f32 %v533_v7, %v262_v61 }
 0x21d   :  { %v278_v11 = vmul.f32 %v424_v8, %v273_v9 }
 0x21f   :  { %v283_v12 = vadd.f32 %v425_v10, %v278_v11 }
 0x221   :  { %v284_v13 = vmax.f32 %v283_v12, 0.0 }
 0x223   :  { %v285_v14 = vpack.c.bf16 %v284_v13, %v284_v13 }
 0x225   :  { %501 = vmatmul.mubr.bf16.vlgmr.msra.gmra.mxu0 %v285_v14 }
 0x2e5   :  { %v388_v16 = vpop.f32.mrf.mxu0 }
 0x2e6   :  { %v389_v17 = vadd.f32 %v426_v15, %v388_v16 }
 0x2e7   :  { %v502_v18 = vpop.f32.mrf.mxu0 }
 0x2e8   :  { %394 = vst [vmem:[#allocation8] sm:$0xff] %v389_v17 }
 0x2e9   :  { %v391_v19 = vpop.f32.mrf.mxu0 }
 0x2ea   :  { %605 = shalt.err (!%p602_p5)
}
 0x2eb   :  { %404 = dma.vmem_to_hbm [thread:$0]  %s402_s2, 128, %s684_s3, [#allocation4]   ;;  %v503_v20 = vpop.f32.mrf.mxu0 }
 0x2ec   :  { %618 = dma.done.wait [#allocation4], 128  }
 0x2ed   :  { %619 = vsyncadd [#allocation4], 4294967168 }
 0x2ee   :  { %408 = vsyncpa [#allocation3], 1 }
 0x2ef   :  { %409 = vsyncpa [#allocation6], 1 }
 0x2f0   :  { %410 = vsyncpa [#allocation4], 1 }

</bundles_post_ra>
